<compile_context>
chip_gen: v7x
topology: tpu7x:2x2x1
jax: 0.10.0
libtpu: 0.0.40
codegen_flags: <defaults>
</compile_context>

<pallas_src>
import functools

import jax
import jax.numpy as jnp
from jax.experimental import pallas as pl
from jax.experimental.pallas import tpu as pltpu

# ----------------------------- model config ---------------------------------
HIDDEN = 768
N_HEADS = 12
HEAD_DIM = 64
FFN = 3072
VOCAB = 100
MAX_POS = 32
LN_EPS = 1e-12


# ------------------------------ Pallas kernels ------------------------------
def _layernorm_kernel(x_ref, g_ref, b_ref, o_ref, *, eps):
    x = x_ref[...].astype(jnp.float32)
    mu = jnp.mean(x, axis=-1, keepdims=True)
    var = jnp.mean((x - mu) ** 2, axis=-1, keepdims=True)
    y = (x - mu) * jax.lax.rsqrt(var + eps)
    o_ref[...] = (y * g_ref[...] + b_ref[...]).astype(o_ref.dtype)


def layernorm(x, gamma, beta, eps=LN_EPS):
    M, H = x.shape
    return pl.pallas_call(
        functools.partial(_layernorm_kernel, eps=eps),
        out_shape=jax.ShapeDtypeStruct((M, H), jnp.float32),
        grid=(1,),
        in_specs=[
            pl.BlockSpec((M, H), lambda i: (0, 0)),
            pl.BlockSpec((1, H), lambda i: (0, 0)),
            pl.BlockSpec((1, H), lambda i: (0, 0)),
        ],
        out_specs=pl.BlockSpec((M, H), lambda i: (0, 0)),
    )(x, gamma, beta)


def _linear_n_kernel(x_ref, w_ref, b_ref, o_ref, *, activation):
    # x: (M, K) any dtype, w: (K, TN) bf16, b: (1, TN) f32 -> o: (M, TN)
    x = x_ref[...].astype(jnp.bfloat16)
    y = jnp.dot(x, w_ref[...], preferred_element_type=jnp.float32)
    y = y + b_ref[...]
    if activation == "gelu":
        y = jax.nn.gelu(y)  # TODO(synk): exact erf GELU for bit-parity with HF
    elif activation == "tanh":
        y = jnp.tanh(y)
    o_ref[...] = y.astype(o_ref.dtype)


def linear_n_tiled(x, w, b, *, activation="none", tn=HIDDEN, out_dtype=jnp.float32):
    """Linear with bias (+ optional activation), tiled over the output dim N so
    the bf16 weight stream is double-buffered and (on v7x) core-parallel."""
    M, K = x.shape
    _, N = w.shape
    tn = min(tn, N)
    assert N % tn == 0
    return pl.pallas_call(
        functools.partial(_linear_n_kernel, activation=activation),
        out_shape=jax.ShapeDtypeStruct((M, N), out_dtype),
        grid=(N // tn,),
        in_specs=[
            pl.BlockSpec((M, K), lambda j: (0, 0)),
            pl.BlockSpec((K, tn), lambda j: (0, j)),
            pl.BlockSpec((1, tn), lambda j: (0, j)),
        ],
        out_specs=pl.BlockSpec((M, tn), lambda j: (0, j)),
        compiler_params=pltpu.CompilerParams(dimension_semantics=("parallel",)),
    )(x, w, b)


def _linear_add_ln_kernel(x_ref, w_ref, b_ref, r_ref, g_ref, bt_ref,
                          o_ref, acc_ref, *, eps):
    # K-tiled matmul accumulator; epilogue fuses bias + residual + LayerNorm.
    k = pl.program_id(0)

    @pl.when(k == 0)
    def _():
        acc_ref[...] = jnp.zeros_like(acc_ref)

    acc_ref[...] += jnp.dot(x_ref[...].astype(jnp.bfloat16), w_ref[...],
                            preferred_element_type=jnp.float32)

    @pl.when(k == pl.num_programs(0) - 1)
    def _():
        y = acc_ref[...] + b_ref[...] + r_ref[...].astype(jnp.float32)
        mu = jnp.mean(y, axis=-1, keepdims=True)
        var = jnp.mean((y - mu) ** 2, axis=-1, keepdims=True)
        z = (y - mu) * jax.lax.rsqrt(var + eps)
        o_ref[...] = (z * g_ref[...] + bt_ref[...]).astype(o_ref.dtype)


def linear_add_ln(x, w, b, res, gamma, beta, *, tk=HIDDEN, eps=LN_EPS):
    """out = LayerNorm(x @ w + b + res), with the matmul tiled over K."""
    M, K = x.shape
    _, N = w.shape
    tk = min(tk, K)
    assert K % tk == 0
    return pl.pallas_call(
        functools.partial(_linear_add_ln_kernel, eps=eps),
        out_shape=jax.ShapeDtypeStruct((M, N), jnp.float32),
        grid=(K // tk,),
        in_specs=[
            pl.BlockSpec((M, tk), lambda k: (0, k)),
            pl.BlockSpec((tk, N), lambda k: (k, 0)),
            pl.BlockSpec((1, N), lambda k: (0, 0)),
            pl.BlockSpec((M, N), lambda k: (0, 0)),
            pl.BlockSpec((1, N), lambda k: (0, 0)),
            pl.BlockSpec((1, N), lambda k: (0, 0)),
        ],
        out_specs=pl.BlockSpec((M, N), lambda k: (0, 0)),
        scratch_shapes=[pltpu.VMEM((M, N), jnp.float32)],
        compiler_params=pltpu.CompilerParams(dimension_semantics=("arbitrary",)),
    )(x, w, b, res, gamma, beta)


def _attn_kernel(q_ref, k_ref, v_ref, m_ref, o_ref):
    # q/k/v: (B*NH, S, DH) bf16 (whole batch in one grid step); mask: (B*NH, S)
    q = q_ref[...]
    k = k_ref[...]
    v = v_ref[...]
    mask = m_ref[...]  # 1.0 = keep, 0.0 = pad
    scale = 1.0 / jnp.sqrt(jnp.float32(q.shape[-1]))
    s = jnp.einsum("hqd,hkd->hqk", q, k,
                   preferred_element_type=jnp.float32) * scale
    s = s + ((1.0 - mask) * (-1e9))[:, None, :]
    s = s - jnp.max(s, axis=-1, keepdims=True)
    p = jnp.exp(s)
    inv = pl.reciprocal(jnp.sum(p, axis=-1, keepdims=True), approx=True)
    o = jnp.einsum("hqk,hkd->hqd", p.astype(v.dtype), v,
                   preferred_element_type=jnp.float32) * inv
    o_ref[...] = o.astype(o_ref.dtype)


def attention(q, k, v, mask):
    BH, S, DH = q.shape
    return pl.pallas_call(
        _attn_kernel,
        out_shape=jax.ShapeDtypeStruct((BH, S, DH), jnp.bfloat16),
        grid=(1,),
        in_specs=[
            pl.BlockSpec((BH, S, DH), lambda i: (0, 0, 0)),
            pl.BlockSpec((BH, S, DH), lambda i: (0, 0, 0)),
            pl.BlockSpec((BH, S, DH), lambda i: (0, 0, 0)),
            pl.BlockSpec((BH, S), lambda i: (0, 0)),
        ],
        out_specs=pl.BlockSpec((BH, S, DH), lambda i: (0, 0, 0)),
    )(q, k, v, mask)


def _pooler_head_kernel(x_ref, wp_ref, bp_ref, w3_ref, b3_ref,
                        w5_ref, b5_ref, w6_ref, b6_ref, o_ref):
    # Fused pooler + classification head; intermediates stay in VMEM/vregs.
    x = x_ref[...].astype(jnp.bfloat16)
    pooled = jnp.tanh(
        jnp.dot(x, wp_ref[...], preferred_element_type=jnp.float32) + bp_ref[...])
    h = jnp.dot(pooled.astype(jnp.bfloat16), w3_ref[...],
                preferred_element_type=jnp.float32) + b3_ref[...]
    h = jnp.dot(h.astype(jnp.bfloat16), w5_ref[...],
                preferred_element_type=jnp.float32) + b5_ref[...]
    logits = jnp.dot(h.astype(jnp.bfloat16), w6_ref[...],
                     preferred_element_type=jnp.float32) + b6_ref[...]
    o_ref[...] = logits.astype(o_ref.dtype)


def pooler_head(x0, p):
    B, _ = x0.shape
    n_out = p["w6"].shape[1]
    args = (x0, p["w_pool"], p["b_pool"], p["w3"], p["b3"],
            p["w5"], p["b5"], p["w6"], p["b6"])
    return pl.pallas_call(
        _pooler_head_kernel,
        out_shape=jax.ShapeDtypeStruct((B, n_out), jnp.float32),
        grid=(1,),
        in_specs=[pl.BlockSpec(a.shape, lambda i: (0, 0)) for a in args],
        out_specs=pl.BlockSpec((B, n_out), lambda i: (0, 0)),
    )(*args)


# ------------------------------ parameters ----------------------------------
def init_params(key):
    ks = iter(jax.random.split(key, 32))

    def w(shape, scale=0.02):
        # bf16 weights: MXU-native on v5e/v6e/v7x, half the HBM bytes.
        return (scale * jax.random.normal(next(ks), shape)).astype(jnp.bfloat16)

    def bias(n):
        return jnp.zeros((1, n), jnp.float32)

    p = {}
    # embeddings (kept f32; gathered in plain JAX)
    p["word_emb"] = (0.02 * jax.random.normal(next(ks), (VOCAB, HIDDEN))).astype(jnp.float32)
    p["pos_emb"] = (0.02 * jax.random.normal(next(ks), (MAX_POS, HIDDEN))).astype(jnp.float32)
    p["emb_ln_g"] = jnp.ones((1, HIDDEN), jnp.float32)
    p["emb_ln_b"] = jnp.zeros((1, HIDDEN), jnp.float32)
    # encoder layer (QKV fused into one weight)
    p["w_qkv"] = w((HIDDEN, 3 * HIDDEN))
    p["b_qkv"] = bias(3 * HIDDEN)
    p["wo"] = w((HIDDEN, HIDDEN))
    p["bo"] = bias(HIDDEN)
    p["ln1_g"] = jnp.ones((1, HIDDEN), jnp.float32)
    p["ln1_b"] = jnp.zeros((1, HIDDEN), jnp.float32)
    p["w_ff1"] = w((HIDDEN, FFN))
    p["b_ff1"] = bias(FFN)
    p["w_ff2"] = w((FFN, HIDDEN))
    p["b_ff2"] = bias(HIDDEN)
    p["ln2_g"] = jnp.ones((1, HIDDEN), jnp.float32)
    p["ln2_b"] = jnp.zeros((1, HIDDEN), jnp.float32)
    # pooler
    p["w_pool"] = w((HIDDEN, HIDDEN))
    p["b_pool"] = bias(HIDDEN)
    # classification head (l3, l5, l6 in the PyTorch module)
    p["w3"] = w((768, 576))
    p["b3"] = bias(576)
    p["w5"] = w((576, 384))
    p["b5"] = bias(384)
    p["w6"] = w((384, 2))
    p["b6"] = bias(2)
    return p


# ------------------------------ forward pass ---------------------------------
def camembert_forward(params, ids, mask):
    B, S = ids.shape
    H, NH, DH = HIDDEN, N_HEADS, HEAD_DIM
    M = B * S

    # --- embeddings (gather is glue; kept in plain JAX) ---
    x = params["word_emb"][ids] + params["pos_emb"][jnp.arange(S)][None, :, :]
    x = x.reshape(M, H).astype(jnp.float32)
    x = layernorm(x, params["emb_ln_g"], params["emb_ln_b"])

    # --- fused QKV projection (one N-tiled bf16 matmul) ---
    qkv = linear_n_tiled(x, params["w_qkv"], params["b_qkv"],
                         tn=H, out_dtype=jnp.bfloat16)          # (M, 3H)
    q, k, v = jnp.split(qkv, 3, axis=-1)

    def split_heads(t):  # (M, H) -> (B*NH, S, DH)
        return t.reshape(B, S, NH, DH).transpose(0, 2, 1, 3).reshape(B * NH, S, DH)

    mask_f = jnp.repeat(mask.astype(jnp.float32), NH, axis=0)   # (B*NH, S)
    ctx = attention(split_heads(q), split_heads(k), split_heads(v), mask_f)
    ctx = ctx.reshape(B, NH, S, DH).transpose(0, 2, 1, 3).reshape(M, H)

    # --- attention output projection fused with residual + LayerNorm ---
    x = linear_add_ln(ctx, params["wo"], params["bo"], x,
                      params["ln1_g"], params["ln1_b"])

    # --- feed-forward: ff1 (+bias+gelu, N-tiled), ff2 fused with residual+LN ---
    ff = linear_n_tiled(x, params["w_ff1"], params["b_ff1"],
                        activation="gelu", tn=H, out_dtype=jnp.bfloat16)
    x = linear_add_ln(ff, params["w_ff2"], params["b_ff2"], x,
                      params["ln2_g"], params["ln2_b"], tk=H)

    # --- pooler (tanh on [CLS]) + classification head, fused in one kernel ---
    # (dropouts l2/l4 are identity in eval mode)
    x0 = x.reshape(B, S, H)[:, 0, :]
    logits = pooler_head(x0, params)
    return logits


# ------------------------------ main -----------------------------------------
if __name__ == "__main__":
    key = jax.random.PRNGKey(0)
    pkey, dkey = jax.random.split(key)
    params = init_params(pkey)

    B, S = 2, 8
    ids = jax.random.randint(dkey, (B, S), 0, VOCAB, dtype=jnp.int32)
    # attention mask: batch 0 fully attended, batch 1 has 2 padding tokens
    mask = jnp.array([[1, 1, 1, 1, 1, 1, 1, 1],
                      [1, 1, 1, 1, 1, 1, 0, 0]], dtype=jnp.int32)

    logits = camembert_forward(params, ids, mask)
    logits = jax.block_until_ready(logits)
    assert logits.shape == (B, 2) and logits.dtype == jnp.float32
    print("KERNEL_OK")
</pallas_src>

<mosaic_0001>
module attributes {stable_mosaic.version = 11 : i64} {
  func.func @_layernorm_kernel(%arg0: i32, %arg1: memref<16x768xf32, #tpu.memory_space<vmem>>, %arg2: memref<1x768xf32, #tpu.memory_space<vmem>>, %arg3: memref<1x768xf32, #tpu.memory_space<vmem>>, %arg4: memref<16x768xf32, #tpu.memory_space<vmem>>) attributes {dimension_semantics = [#tpu.dimension_semantics<arbitrary>], iteration_bounds = array<i64: 1>, scalar_prefetch = 0 : i64, scratch_operands = 0 : i64, tpu.core_type = #tpu.core_type<tc>, window_params = [{pipeline_mode = #tpu.pipeline_mode<synchronous>, transform_indices = @transform_0, window_bounds = array<i64: 16, 768>}, {pipeline_mode = #tpu.pipeline_mode<synchronous>, transform_indices = @transform_1, window_bounds = array<i64: 1, 768>}, {pipeline_mode = #tpu.pipeline_mode<synchronous>, transform_indices = @transform_2, window_bounds = array<i64: 1, 768>}, {pipeline_mode = #tpu.pipeline_mode<synchronous>, transform_indices = @transform_3, window_bounds = array<i64: 16, 768>}]} {
    %c0 = arith.constant 0 : index
    %c0_0 = arith.constant 0 : index
    %0 = vector.load %arg1[%c0, %c0_0] : memref<16x768xf32, #tpu.memory_space<vmem>>, vector<16x768xf32>
    %cst = arith.constant dense<0.000000e+00> : vector<16xf32>
    %1 = vector.multi_reduction <add>, %0, %cst [1] : vector<16x768xf32> to vector<16xf32>
    %2 = vector.shape_cast %1 : vector<16xf32> to vector<16x1xf32>
    %cst_1 = arith.constant 7.680000e+02 : f32
    %3 = vector.broadcast %cst_1 : f32 to vector<16x1xf32>
    %4 = arith.divf %2, %3 : vector<16x1xf32>
    %5 = vector.broadcast %4 : vector<16x1xf32> to vector<16x768xf32>
    %6 = arith.subf %0, %5 : vector<16x768xf32>
    %7 = arith.mulf %6, %6 : vector<16x768xf32>
    %cst_2 = arith.constant dense<0.000000e+00> : vector<16xf32>
    %8 = vector.multi_reduction <add>, %7, %cst_2 [1] : vector<16x768xf32> to vector<16xf32>
    %9 = vector.shape_cast %8 : vector<16xf32> to vector<16x1xf32>
    %cst_3 = arith.constant 7.680000e+02 : f32
    %10 = vector.broadcast %cst_3 : f32 to vector<16x1xf32>
    %11 = arith.divf %9, %10 : vector<16x1xf32>
    %12 = vector.broadcast %4 : vector<16x1xf32> to vector<16x768xf32>
    %13 = arith.subf %0, %12 : vector<16x768xf32>
    %cst_4 = arith.constant 9.99999996E-13 : f32
    %14 = vector.broadcast %cst_4 : f32 to vector<16x1xf32>
    %15 = arith.addf %11, %14 : vector<16x1xf32>
    %16 = math.rsqrt %15 : vector<16x1xf32>
    %17 = vector.broadcast %16 : vector<16x1xf32> to vector<16x768xf32>
    %18 = arith.mulf %13, %17 : vector<16x768xf32>
    %c0_5 = arith.constant 0 : index
    %c0_6 = arith.constant 0 : index
    %19 = vector.load %arg2[%c0_5, %c0_6] : memref<1x768xf32, #tpu.memory_space<vmem>>, vector<1x768xf32>
    %20 = vector.broadcast %19 : vector<1x768xf32> to vector<16x768xf32>
    %21 = arith.mulf %18, %20 : vector<16x768xf32>
    %c0_7 = arith.constant 0 : index
    %c0_8 = arith.constant 0 : index
    %22 = vector.load %arg3[%c0_7, %c0_8] : memref<1x768xf32, #tpu.memory_space<vmem>>, vector<1x768xf32>
    %23 = vector.broadcast %22 : vector<1x768xf32> to vector<16x768xf32>
    %24 = arith.addf %21, %23 : vector<16x768xf32>
    %c0_9 = arith.constant 0 : index
    %c0_10 = arith.constant 0 : index
    %25 = vector.load %arg4[%c0_9, %c0_10] : memref<16x768xf32, #tpu.memory_space<vmem>>, vector<16x768xf32>
    tpu.vector_store %arg4[%c0_9, %c0_10], %24 {strides = array<i32>} : memref<16x768xf32, #tpu.memory_space<vmem>>, vector<16x768xf32>,
    return
  }
  func.func @transform_0(%arg0: i32) -> (i32, i32) {
    %c0_i32 = arith.constant 0 : i32
    %c0_i32_0 = arith.constant 0 : i32
    %c0_i32_1 = arith.constant 0 : i32
    return %c0_i32, %c0_i32_0 : i32, i32
  }
  func.func @transform_1(%arg0: i32) -> (i32, i32) {
    %c0_i32 = arith.constant 0 : i32
    %c0_i32_0 = arith.constant 0 : i32
    %c0_i32_1 = arith.constant 0 : i32
    return %c0_i32, %c0_i32_0 : i32, i32
  }
  func.func @transform_2(%arg0: i32) -> (i32, i32) {
    %c0_i32 = arith.constant 0 : i32
    %c0_i32_0 = arith.constant 0 : i32
    %c0_i32_1 = arith.constant 0 : i32
    return %c0_i32, %c0_i32_0 : i32, i32
  }
  func.func @transform_3(%arg0: i32) -> (i32, i32) {
    %c0_i32 = arith.constant 0 : i32
    %c0_i32_0 = arith.constant 0 : i32
    %c0_i32_1 = arith.constant 0 : i32
    return %c0_i32, %c0_i32_0 : i32, i32
  }
}

</mosaic_0001>

<bundles_post_ra>
// kernel: tpu_custom_call.1
= control target key start
LH: loop header
LB: loop body
LE: loop exit
PB: predicated region body
PF: predicated region fallthrough
CT: control target
= control target key end

     0   :  { %8 = vsyncpa [#allocation3], 0  ;;  %s440_s0 = inlined_call_operand.hbm [shape: f32[16,768], index: 0, kind: input, shape index: {}]   ;;  %s441_s1 = inlined_call_operand.hbm [shape: f32[1,768], index: 1, kind: input, shape index: {}]   ;;  %s442_s2 = inlined_call_operand.vmem [shape: f32[1,768], index: 2, kind: input, shape index: {}]   ;;  %s443_s3 = inlined_call_operand.hbm [shape: f32[16,768], index: 3, kind: output, shape index: {}]  }
   0x1   :  { %9 = vsyncpa [#allocation6], 0 }
   0x2   :  { %10 = vsyncpa [#allocation4], 0  ;;  %s325_s12 = smov [#allocation2]   ;;  %s253_s16 = scalar_lea.hbm %s440_s0, 1536 }
   0x3   :  { %s16_s13 = sshll.u32 %s325_s12, 4  ;;  %p254_p0 = scmp.ne.s32.totalorder %s440_s0, %s253_s16  ;;  %s17_s13 = int_to_ptr.vmem [resolvable:$true] %s16_s13 }
   0x4   :  { %p257_p1 = scmp.lt.u32.totalorder %s253_s16, %s440_s0 }
   0x6   :  { %p259_p2 = pnand %p257_p1, %p254_p0 }
   0x8   :  { %262 = shalt.err (!%p259_p2)
}
   0x9   :  { %s263_s21 = scalar_lea.vmem %s17_s13, 1536  ;;  %p268_p4 = scmp.lt.s32.totalorder %s17_s13, %s17_s13 }
   0xa   :  { %p264_p3 = scmp.ne.s32.totalorder %s17_s13, %s263_s21  ;;  %p269_p5 = scmp.lt.s32.totalorder %s263_s21, %s263_s21 }
   0xc   :  { %p270_p6 = por %p269_p5, %p268_p4 }
   0xe   :  { %p271_p7 = pnand %p270_p6, %p264_p3 }
  0x10   :  { %274 = shalt.err (!%p271_p7)
}
  0x11   :  { %s326_s22 = smov 768   ;;  %s327_s23 = smov 48  }
  0x12   :  { %22 = dma.hbm_to_vmem [thread:$0]  %s440_s0, 1536, %s17_s13, [#allocation3], %s326_s22, %s326_s22, %s327_s23  }
  0x13   :  { %s328_s26 = smov [#allocation5]   ;;  %s275_s30 = scalar_lea.hbm %s441_s1, 96 }
  0x14   :  { %s29_s27 = sshll.u32 %s328_s26, 4  ;;  %p276_p8 = scmp.ne.s32.totalorder %s441_s1, %s275_s30  ;;  %s30_s27 = int_to_ptr.vmem [resolvable:$true] %s29_s27 }
  0x15   :  { %p279_p9 = scmp.lt.u32.totalorder %s275_s30, %s441_s1 }
  0x17   :  { %p281_p10 = pnand %p279_p9, %p276_p8 }
  0x19   :  { %284 = shalt.err (!%p281_p10)
}
  0x1a   :  { %s285_s8 = scalar_lea.vmem %s30_s27, 96  ;;  %p290_p12 = scmp.lt.s32.totalorder %s30_s27, %s30_s27 }
  0x1b   :  { %p286_p11 = scmp.ne.s32.totalorder %s30_s27, %s285_s8  ;;  %p291_p13 = scmp.lt.s32.totalorder %s285_s8, %s285_s8 }
  0x1d   :  { %p292_p0 = por %p291_p13, %p290_p12 }
  0x1f   :  { %p293_p1 = pnand %p292_p0, %p286_p11 }
  0x21   :  { %296 = shalt.err (!%p293_p1)
}
  0x22   :  { %32 = dma.hbm_to_vmem [thread:$0]  %s441_s1, 96, %s30_s27, [#allocation6]  }
  0x23   :  { %319 = dma.done.wait [#allocation3], 1536  }
  0x24   :  { %320 = vsyncadd [#allocation3], 4294965760 }
  0x25   :  { %321 = dma.done.wait [#allocation6], 96  }
  0x26   :  { %322 = vsyncadd [#allocation6], 4294967200  ;;  %v41_v0 = vld [vmem:[#allocation2] sm:$0xff]  ;;  %v42_v1 = vld [vmem:[#allocation2 + $0x8] sm:$0xff]  ;;  %v128_v62 = vlaneseq }
  0x27   :  { %v43_v2 = vld [vmem:[#allocation2 + $0x10] sm:$0xff]  ;;  %v44_v3 = vld [vmem:[#allocation2 + $0x18] sm:$0xff]  ;;  %v53_v4 = vadd.f32 %v42_v1, %v41_v0  ;;  %v49_v7 = vld [vmem:[#allocation2 + $0x40] sm:$0xff] }
  0x28   :  { %v47_v5 = vld [vmem:[#allocation2 + $0x30] sm:$0xff]  ;;  %v48_v6 = vld [vmem:[#allocation2 + $0x38] sm:$0xff]  ;;  %v45_v10 = vld [vmem:[#allocation2 + $0x20] sm:$0xff] }
  0x29   :  { %v54_v8 = vadd.f32 %v53_v4, %v43_v2  ;;  %v60_v9 = vadd.f32 %v48_v6, %v47_v5  ;;  %v50_v11 = vld [vmem:[#allocation2 + $0x48] sm:$0xff]  ;;  %v51_v15 = vld [vmem:[#allocation2 + $0x50] sm:$0xff]  ;;  %v52_v18 = vld [vmem:[#allocation2 + $0x58] sm:$0xff] }
  0x2a   :  { %v46_v14 = vld [vmem:[#allocation2 + $0x28] sm:$0xff] }
  0x2b   :  { %v55_v12 = vadd.f32 %v54_v8, %v44_v3  ;;  %v61_v13 = vadd.f32 %v60_v9, %v49_v7  ;;  %v126_v8 = vld [vmem:[#allocation5] sm:$0x3f] }
  0x2d   :  { %v56_v16 = vadd.f32 %v55_v12, %v45_v10  ;;  %v62_v17 = vadd.f32 %v61_v13, %v50_v11 }
  0x2f   :  { %v57_v19 = vadd.f32 %v56_v16, %v46_v14  ;;  %v63_v20 = vadd.f32 %v62_v17, %v51_v15 }
  0x31   :  { %58 = vadd.xlane.f32.xlu0 %v57_v19  ;;  %v64_v21 = vadd.f32 %v63_v20, %v52_v18 }
  0x35   :  { %65 = vadd.xlane.f32.xlu0 %v64_v21 }
  0xbe   :  { %v59_v22 = vpop.xlane.xlu0 %58 }
  0xbf   :  { %v68_v23 = vmul.f32 0.0013020834, %v59_v22 }
  0xc1   :  { %v377_v24 = vsub.f32 %v41_v0, %v68_v23  ;;  %v379_v25 = vsub.f32 %v42_v1, %v68_v23  ;;  %v381_v26 = vsub.f32 %v43_v2, %v68_v23  ;;  %v383_v28 = vsub.f32 %v44_v3, %v68_v23 }
  0xc2   :  { %v66_v27 = vpop.xlane.xlu0 %65  ;;  %v74_v32 = vsub.f32 %v45_v10, %v68_v23  ;;  %v75_v38 = vsub.f32 %v46_v14, %v68_v23  ;;  %v129_v2 = vshrl.u32 %v128_v62, 7 }
  0xc3   :  { %v69_v29 = vmul.f32 0.0013020834, %v66_v27  ;;  %v82_v30 = vmul.f32 %v377_v24, %v377_v24  ;;  %v83_v31 = vmul.f32 %v379_v25, %v379_v25  ;;  %v84_v33 = vmul.f32 %v381_v26, %v381_v26 }
  0xc4   :  { %v85_v39 = vmul.f32 %v383_v28, %v383_v28  ;;  %v86_v44 = vmul.f32 %v74_v32, %v74_v32  ;;  %v87_v49 = vmul.f32 %v75_v38, %v75_v38  ;;  %v130_v4 = vsub.s32 0, %v129_v2 }
  0xc5   :  { %v94_v34 = vadd.f32 %v83_v31, %v82_v30  ;;  %v391_v35 = vsub.f32 %v47_v5, %v69_v29  ;;  %v393_v36 = vsub.f32 %v48_v6, %v69_v29  ;;  %v395_v37 = vsub.f32 %v49_v7, %v69_v29 }
  0xc6   :  { %v399_v41 = vsub.f32 %v50_v11, %v69_v29  ;;  %v405_v46 = vsub.f32 %v51_v15, %v69_v29  ;;  %v81_v51 = vsub.f32 %v52_v18, %v69_v29  ;;  %v134_v5 = vsub.s32 1, %v129_v2  ;;  %v170_v11 = vld [vmem:[%s442_s2] sm:$0x3f]  ;;  %s329_s2 = smov [#allocation7]  }
  0xc7   :  { %v95_v40 = vadd.f32 %v94_v34, %v84_v33  ;;  %v88_v42 = vmul.f32 %v391_v35, %v391_v35  ;;  %v89_v43 = vmul.f32 %v393_v36, %v393_v36  ;;  %v90_v47 = vmul.f32 %v395_v37, %v395_v37  ;;  %s231_s11 = sshll.u32 %s329_s2, 4  ;;  %s232_s11 = int_to_ptr.vmem [resolvable:$true] %s231_s11 }
  0xc8   :  { %v91_v52 = vmul.f32 %v399_v41, %v399_v41  ;;  %v92_v55 = vmul.f32 %v405_v46, %v405_v46  ;;  %v93_v57 = vmul.f32 %v81_v51, %v81_v51  ;;  %v138_v6 = vsub.s32 2, %v129_v2  ;;  %s297_s12 = scalar_lea.vmem %s232_s11, 1536  ;;  %p302_p3 = scmp.lt.s32.totalorder %s232_s11, %s232_s11 }
  0xc9   :  { %v96_v45 = vadd.f32 %v95_v40, %v85_v39  ;;  %v101_v48 = vadd.f32 %v89_v43, %v88_v42  ;;  %v142_v7 = vsub.s32 3, %v129_v2  ;;  %v146_v9 = vsub.s32 4, %v129_v2  ;;  %p298_p2 = scmp.ne.s32.totalorder %s232_s11, %s297_s12  ;;  %p303_p4 = scmp.lt.s32.totalorder %s297_s12, %s297_s12 }
  0xca   :  { %v150_v10 = vsub.s32 5, %v129_v2  ;;  %v131_v12 = vrot.slane %v126_v8, %v130_v4  ;;  %v135_v13 = vrot.slane %v126_v8, %v134_v5  ;;  %v139_v14 = vrot.slane %v126_v8, %v138_v6 }
  0xcb   :  { %v97_v50 = vadd.f32 %v96_v45, %v86_v44  ;;  %v102_v53 = vadd.f32 %v101_v48, %v90_v47  ;;  %v143_v15 = vrot.slane %v126_v8, %v142_v7  ;;  %v147_v17 = vrot.slane %v126_v8, %v146_v9  ;;  %p304_p5 = por %p303_p4, %p302_p3 }
  0xcc   :  { %v151_v18 = vrot.slane %v126_v8, %v150_v10  ;;  %v175_v19 = vrot.slane %v170_v11, %v130_v4  ;;  %v179_v20 = vrot.slane %v170_v11, %v134_v5  ;;  %v183_v31 = vrot.slane %v170_v11, %v138_v6 }
  0xcd   :  { %v98_v54 = vadd.f32 %v97_v50, %v87_v49  ;;  %v103_v56 = vadd.f32 %v102_v53, %v91_v52  ;;  %v187_v33 = vrot.slane %v170_v11, %v142_v7  ;;  %v191_v40 = vrot.slane %v170_v11, %v146_v9  ;;  %p305_p6 = pnand %p304_p5, %p298_p2 }
  0xce   :  { %v195_v42 = vrot.slane %v170_v11, %v150_v10 }
  0xcf   :  { %99 = vadd.xlane.f32.xlu1 %v98_v54  ;;  %v104_v58 = vadd.f32 %v103_v56, %v92_v55 }
  0xd1   :  { %v105_v59 = vadd.f32 %v104_v58, %v93_v57 }
  0xd3   :  { %106 = vadd.xlane.f32.xlu1 %v105_v59 }
 0x15c   :  { %v100_v60 = vpop.xlane.xlu1 %99 }
 0x15d   :  { %v108_v61 = vmul.f32 0.0013020834, %v100_v60 }
 0x15f   :  { %v110_v63 = vadd.f32 1e-12, %v108_v61 }
 0x160   :  { %v107_v0 = vpop.xlane.xlu1 %106 }
 0x161   :  { %249 = vrsqrt.f32 %v110_v63  ;;  %v109_v1 = vmul.f32 0.0013020834, %v107_v0 }
 0x163   :  { %v111_v3 = vadd.f32 1e-12, %v109_v1 }
 0x165   :  { %251 = vrsqrt.f32 %v111_v3 }
 0x16b   :  { %v250_v16 = vpop.eup %249 }
 0x16c   :  { %v114_v21 = vmul.f32 %v250_v16, %v377_v24  ;;  %v115_v22 = vmul.f32 %v250_v16, %v379_v25  ;;  %v116_v23 = vmul.f32 %v250_v16, %v381_v26  ;;  %v117_v27 = vmul.f32 %v250_v16, %v383_v28 }
 0x16d   :  { %v118_v29 = vmul.f32 %v250_v16, %v74_v32  ;;  %v119_v30 = vmul.f32 %v250_v16, %v75_v38 }
 0x16e   :  { %v158_v34 = vmul.f32 %v131_v12, %v114_v21  ;;  %v159_v39 = vmul.f32 %v135_v13, %v115_v22  ;;  %v160_v44 = vmul.f32 %v139_v14, %v116_v23  ;;  %v161_v45 = vmul.f32 %v143_v15, %v117_v27 }
 0x16f   :  { %v252_v43 = vpop.eup %251  ;;  %v162_v47 = vmul.f32 %v147_v17, %v118_v29  ;;  %v163_v48 = vmul.f32 %v151_v18, %v119_v30 }
 0x170   :  { %v120_v24 = vmul.f32 %v252_v43, %v391_v35  ;;  %v121_v25 = vmul.f32 %v252_v43, %v393_v36  ;;  %v122_v26 = vmul.f32 %v252_v43, %v395_v37  ;;  %v123_v28 = vmul.f32 %v252_v43, %v399_v41 }
 0x171   :  { %v124_v32 = vmul.f32 %v252_v43, %v405_v46  ;;  %v125_v38 = vmul.f32 %v252_v43, %v81_v51  ;;  %v202_v49 = vadd.f32 %v175_v19, %v158_v34  ;;  %v203_v50 = vadd.f32 %v179_v20, %v159_v39 }
 0x172   :  { %v164_v52 = vmul.f32 %v131_v12, %v120_v24  ;;  %v165_v53 = vmul.f32 %v135_v13, %v121_v25  ;;  %v166_v54 = vmul.f32 %v139_v14, %v122_v26  ;;  %v167_v55 = vmul.f32 %v143_v15, %v123_v28 }
 0x173   :  { %v168_v56 = vmul.f32 %v147_v17, %v124_v32  ;;  %v169_v57 = vmul.f32 %v151_v18, %v125_v38  ;;  %v204_v35 = vadd.f32 %v183_v31, %v160_v44  ;;  %v205_v58 = vadd.f32 %v187_v33, %v161_v45  ;;  %214 = vst [vmem:[#allocation7] sm:$0xff] %v202_v49 }
 0x174   :  { %215 = vst [vmem:[#allocation7 + $0x8] sm:$0xff] %v203_v50  ;;  %v206_v36 = vadd.f32 %v191_v40, %v162_v47  ;;  %v207_v37 = vadd.f32 %v195_v42, %v163_v48  ;;  %v208_v41 = vadd.f32 %v175_v19, %v164_v52  ;;  %v209_v59 = vadd.f32 %v179_v20, %v165_v53 }
 0x175   :  { %v210_v46 = vadd.f32 %v183_v31, %v166_v54  ;;  %v211_v51 = vadd.f32 %v187_v33, %v167_v55  ;;  %v212_v60 = vadd.f32 %v191_v40, %v168_v56  ;;  %v213_v61 = vadd.f32 %v195_v42, %v169_v57  ;;  %216 = vst [vmem:[#allocation7 + $0x10] sm:$0xff] %v204_v35 }
 0x176   :  { %217 = vst [vmem:[#allocation7 + $0x18] sm:$0xff] %v205_v58  ;;  %218 = vst [vmem:[#allocation7 + $0x20] sm:$0xff] %v206_v36 }
 0x177   :  { %219 = vst [vmem:[#allocation7 + $0x28] sm:$0xff] %v207_v37  ;;  %220 = vst [vmem:[#allocation7 + $0x30] sm:$0xff] %v208_v41 }
 0x178   :  { %221 = vst [vmem:[#allocation7 + $0x38] sm:$0xff] %v209_v59  ;;  %222 = vst [vmem:[#allocation7 + $0x40] sm:$0xff] %v210_v46 }
 0x179   :  { %223 = vst [vmem:[#allocation7 + $0x48] sm:$0xff] %v211_v51  ;;  %224 = vst [vmem:[#allocation7 + $0x50] sm:$0xff] %v212_v60 }
 0x17a   :  { %225 = vst [vmem:[#allocation7 + $0x58] sm:$0xff] %v213_v61 }
 0x17b   :  { %308 = shalt.err (!%p305_p6)
}
 0x17c   :  { %s309_s15 = scalar_lea.hbm %s443_s3, 1536 }
 0x17d   :  { %p310_p7 = scmp.ne.s32.totalorder %s443_s3, %s309_s15  ;;  %p313_p8 = scmp.lt.u32.totalorder %s309_s15, %s443_s3 }
 0x17f   :  { %p315_p9 = pnand %p313_p8, %p310_p7 }
 0x181   :  { %318 = shalt.err (!%p315_p9)
}
 0x182   :  { %237 = dma.vmem_to_hbm [thread:$0]  %s232_s11, 1536, %s443_s3, [#allocation4], %s326_s22, %s326_s22, %s327_s23  }
 0x183   :  { %323 = dma.done.wait [#allocation4], 1536  }
 0x184   :  { %324 = vsyncadd [#allocation4], 4294965760 }
 0x185   :  { %241 = vsyncpa [#allocation3], 1 }
 0x186   :  { %242 = vsyncpa [#allocation6], 1 }
 0x187   :  { %243 = vsyncpa [#allocation4], 1 }

</bundles_post_ra>
